<compile_context>
chip_gen: v6e
topology: v6e:2x2x1
jax: 0.10.0
libtpu: 0.0.40
codegen_flags: <defaults>
</compile_context>

<pallas_src>
import functools

import jax
import jax.numpy as jnp
from jax.experimental import pallas as pl
from jax.experimental.pallas import tpu as pltpu

_MAX_TILE_M = 4096            # columns (points) per grid step; intermediates at this
                              # size are ~6-12 MiB of f32 VMEM — safe on v5e/v6e/v7x.
_VMEM_LIMIT_BYTES = 48 * 1024 * 1024   # above 16/32 MiB scoped defaults, < 64 MiB v7x physical.


def _round_up(n, m):
    return (n + m - 1) // m * m


def _silu(v):
    # SiLU(x) = x * sigmoid(x) = 0.5 * x * (tanh(x/2) + 1).
    # One EUP op (tanh) per element; the extra mul/add ride the 4-wide VALU which has slack.
    return 0.5 * v * (jnp.tanh(0.5 * v) + 1.0)


def surface_mlp_kernel(xT_ref, w1_ref, b1_ref, w2_ref, b2_ref,
                       w3_ref, b3_ref, w4_ref, b4_ref, oT_ref):
    xT = xT_ref[...]                     # (2, tm) f32, lane-dense
    w1 = w1_ref[...]                     # (64, 2)

    # Layer 1 (K=2): two broadcast FMAs on the VPU.  w1 columns / b1 are lane-broadcast
    # once per tile; the xT rows are cheap sublane broadcasts.
    h1 = _silu(w1[:, 0:1] * xT[0:1, :] + w1[:, 1:2] * xT[1:2, :] + b1_ref[...])

    # Layers 2/3 on the MXU; tile_m sits on the MXU's wide output (N) axis.
    h2 = _silu(jnp.dot(w2_ref[...], h1, preferred_element_type=jnp.float32) + b2_ref[...])
    h3 = _silu(jnp.dot(w3_ref[...], h2, preferred_element_type=jnp.float32) + b3_ref[...])

    # Layer 4 -> (3, tm): lane-dense store, only 12 useful bytes per point written to HBM.
    oT_ref[...] = (jnp.dot(w4_ref[...], h3, preferred_element_type=jnp.float32)
                   + b4_ref[...]).astype(oT_ref.dtype)


def _const_spec(shape):
    # Whole (tiny) parameter array, same block every grid step -> stays resident in VMEM.
    nd = len(shape)
    return pl.BlockSpec(shape, lambda i, _nd=nd: (0,) * _nd)


@functools.partial(jax.jit, static_argnames=("tile_m",))
def _surface_mlp_forward_impl(x, params, tile_m):
    N, in_dim = x.shape
    assert in_dim == 2

    xT = x.T                               # (2, N): contiguous 4N-byte rows for the DMA.

    w1, b1 = params["w1"], params["b1"]    # (64, 2),  (64, 1)
    w2, b2 = params["w2"], params["b2"]    # (128, 64), (128, 1)
    w3, b3 = params["w3"], params["b3"]    # (64, 128), (64, 1)
    w4, b4 = params["w4"], params["b4"]    # (3, 64),  (3, 1)

    grid = (pl.cdiv(N, tile_m),)           # ragged last block handled by Pallas masking.

    outT = pl.pallas_call(
        surface_mlp_kernel,
        out_shape=jax.ShapeDtypeStruct((3, N), x.dtype),
        grid_spec=pltpu.PrefetchScalarGridSpec(
            num_scalar_prefetch=0,
            grid=grid,
            in_specs=[
                pl.BlockSpec((2, tile_m), lambda i: (0, i)),     # x^T column tile
                _const_spec(w1.shape), _const_spec(b1.shape),
                _const_spec(w2.shape), _const_spec(b2.shape),
                _const_spec(w3.shape), _const_spec(b3.shape),
                _const_spec(w4.shape), _const_spec(b4.shape),
            ],
            out_specs=pl.BlockSpec((3, tile_m), lambda i: (0, i)),
        ),
        compiler_params=pltpu.CompilerParams(
            # Column axis is embarrassingly parallel: with >= 2 grid steps it shards
            # across both TensorCores on v7x; 1-TC chips (v5e/v6e) are unaffected.
            dimension_semantics=("parallel",),
            vmem_limit_bytes=_VMEM_LIMIT_BYTES,
        ),
    )(xT, w1, b1, w2, b2, w3, b3, w4, b4)

    return outT.T                          # (N, 3), matching the PyTorch module.


def _choose_tile_m(N):
    if N <= 512:
        # Single block equal to the full lane extent (satisfies the (8,128) rule by
        # matching the array dim exactly); per-step overhead dominates tiny batches.
        return N
    # At least 2 grid steps for v7x's 2 TensorCores, tiles a multiple of 128 lanes,
    # capped so f32 intermediates stay well inside the 64 MiB v7x VMEM.
    half = _round_up(pl.cdiv(N, 2), 128)
    return min(half, _MAX_TILE_M)


def surface_mlp_forward(x, params, *, tile_m=None):
    """x: [N, 2] float32 (alpha, beta) points.  params: w1..w4 in PyTorch [out, in]
    layout, b1..b4 as [out, 1] columns.  Returns [N, 3]."""
    if tile_m is None:
        tile_m = _choose_tile_m(x.shape[0])
    return _surface_mlp_forward_impl(x, params, tile_m)


def init_params(key):
    """Deterministic init mimicking nn.Linear's uniform(-1/sqrt(fan_in), 1/sqrt(fan_in)).

    Weights are stored in PyTorch's [out, in] layout, biases as [out, 1]."""
    dims = [(2, 64), (64, 128), (128, 64), (64, 3)]
    params = {}
    keys = jax.random.split(key, 2 * len(dims))
    for idx, (fin, fout) in enumerate(dims):
        bound = 1.0 / (fin ** 0.5)
        w = jax.random.uniform(keys[2 * idx], (fout, fin),
                               minval=-bound, maxval=bound, dtype=jnp.float32)
        b = jax.random.uniform(keys[2 * idx + 1], (fout, 1),
                               minval=-bound, maxval=bound, dtype=jnp.float32)
        params[f"w{idx + 1}"] = w
        params[f"b{idx + 1}"] = b
    return params


def reference_forward(x, params):
    hp = jax.lax.Precision.HIGHEST
    h = x
    for i in (1, 2, 3):
        h = jnp.dot(h, params[f"w{i}"].T, precision=hp) + params[f"b{i}"].T
        h = h * jax.nn.sigmoid(h)
    return jnp.dot(h, params["w4"].T, precision=hp) + params["b4"].T


# TODO(synk): loss(), compute_jacobian(), sample_batch() and the Adam training loop rely
# on torch autograd / external lam_data.npy and are outside the forward pass, so they
# are not translated here.
# TODO(synk): out-of-bounds columns of a ragged last block compute on undefined input
# (values are discarded); mask the tail in-kernel if NaN-detection tooling is in use.


if __name__ == "__main__":
    key = jax.random.PRNGKey(0)
    pkey, xkey = jax.random.split(key)

    params = init_params(pkey)

    # Small batch: single grid step (block == full lane extent).
    N = 256
    x = jax.random.uniform(xkey, (N, 2), minval=-1.0, maxval=1.0, dtype=jnp.float32)
    out = jax.block_until_ready(surface_mlp_forward(x, params))
    ref = reference_forward(x, params)
    assert out.shape == (N, 3)
    assert jnp.allclose(out, ref, atol=2e-3, rtol=2e-3), float(jnp.max(jnp.abs(out - ref)))

    # Mid-size batch: 2-step "parallel" grid (v7x megacore path) with a ragged last block.
    N2 = 1000
    x2 = jax.random.uniform(jax.random.PRNGKey(1), (N2, 2),
                            minval=-1.0, maxval=1.0, dtype=jnp.float32)
    out2 = jax.block_until_ready(surface_mlp_forward(x2, params))
    ref2 = reference_forward(x2, params)
    assert out2.shape == (N2, 3)
    assert jnp.allclose(out2, ref2, atol=2e-3, rtol=2e-3), float(jnp.max(jnp.abs(out2 - ref2)))

    print("KERNEL_OK")
</pallas_src>

<mosaic_0001>
module attributes {stable_mosaic.version = 11 : i64} {
  func.func @surface_mlp_kernel(%arg0: i32, %arg1: memref<2x256xf32, #tpu.memory_space<vmem>>, %arg2: memref<64x2xf32, #tpu.memory_space<vmem>>, %arg3: memref<64x1xf32, #tpu.memory_space<vmem>>, %arg4: memref<128x64xf32, #tpu.memory_space<vmem>>, %arg5: memref<128x1xf32, #tpu.memory_space<vmem>>, %arg6: memref<64x128xf32, #tpu.memory_space<vmem>>, %arg7: memref<64x1xf32, #tpu.memory_space<vmem>>, %arg8: memref<3x64xf32, #tpu.memory_space<vmem>>, %arg9: memref<3x1xf32, #tpu.memory_space<vmem>>, %arg10: memref<3x256xf32, #tpu.memory_space<vmem>>) attributes {dimension_semantics = [#tpu.dimension_semantics<parallel>], iteration_bounds = array<i64: 1>, scalar_prefetch = 0 : i64, scratch_operands = 0 : i64, tpu.core_type = #tpu.core_type<tc>, window_params = [{transform_indices = @transform_0, window_bounds = array<i64: 2, 256>}, {pipeline_mode = #tpu.pipeline_mode<synchronous>, transform_indices = @transform_1, window_bounds = array<i64: 64, 2>}, {pipeline_mode = #tpu.pipeline_mode<synchronous>, transform_indices = @transform_2, window_bounds = array<i64: 64, 1>}, {pipeline_mode = #tpu.pipeline_mode<synchronous>, transform_indices = @transform_3, window_bounds = array<i64: 128, 64>}, {pipeline_mode = #tpu.pipeline_mode<synchronous>, transform_indices = @transform_4, window_bounds = array<i64: 128, 1>}, {pipeline_mode = #tpu.pipeline_mode<synchronous>, transform_indices = @transform_5, window_bounds = array<i64: 64, 128>}, {pipeline_mode = #tpu.pipeline_mode<synchronous>, transform_indices = @transform_6, window_bounds = array<i64: 64, 1>}, {pipeline_mode = #tpu.pipeline_mode<synchronous>, transform_indices = @transform_7, window_bounds = array<i64: 3, 64>}, {pipeline_mode = #tpu.pipeline_mode<synchronous>, transform_indices = @transform_8, window_bounds = array<i64: 3, 1>}, {transform_indices = @transform_9, window_bounds = array<i64: 3, 256>}]} {
    %c0 = arith.constant 0 : index
    %c0_0 = arith.constant 0 : index
    %0 = vector.load %arg1[%c0, %c0_0] : memref<2x256xf32, #tpu.memory_space<vmem>>, vector<2x256xf32>
    %c0_1 = arith.constant 0 : index
    %c0_2 = arith.constant 0 : index
    %1 = vector.load %arg2[%c0_1, %c0_2] : memref<64x2xf32, #tpu.memory_space<vmem>>, vector<64x2xf32>
    %2 = vector.extract_strided_slice %1 {offsets = [0, 0], sizes = [64, 1], strides = [1, 1]} : vector<64x2xf32> to vector<64x1xf32>
    %3 = vector.extract_strided_slice %0 {offsets = [0, 0], sizes = [1, 256], strides = [1, 1]} : vector<2x256xf32> to vector<1x256xf32>
    %4 = vector.broadcast %2 : vector<64x1xf32> to vector<64x256xf32>
    %5 = vector.broadcast %3 : vector<1x256xf32> to vector<64x256xf32>
    %6 = arith.mulf %4, %5 : vector<64x256xf32>
    %7 = vector.extract_strided_slice %1 {offsets = [0, 1], sizes = [64, 1], strides = [1, 1]} : vector<64x2xf32> to vector<64x1xf32>
    %8 = vector.extract_strided_slice %0 {offsets = [1, 0], sizes = [1, 256], strides = [1, 1]} : vector<2x256xf32> to vector<1x256xf32>
    %9 = vector.broadcast %7 : vector<64x1xf32> to vector<64x256xf32>
    %10 = vector.broadcast %8 : vector<1x256xf32> to vector<64x256xf32>
    %11 = arith.mulf %9, %10 : vector<64x256xf32>
    %12 = arith.addf %6, %11 : vector<64x256xf32>
    %c0_3 = arith.constant 0 : index
    %c0_4 = arith.constant 0 : index
    %13 = vector.load %arg3[%c0_3, %c0_4] : memref<64x1xf32, #tpu.memory_space<vmem>>, vector<64x1xf32>
    %14 = vector.broadcast %13 : vector<64x1xf32> to vector<64x256xf32>
    %15 = arith.addf %12, %14 : vector<64x256xf32>
    %cst = arith.constant 5.000000e-01 : f32
    %16 = vector.broadcast %cst : f32 to vector<64x256xf32>
    %17 = arith.mulf %16, %15 : vector<64x256xf32>
    %cst_5 = arith.constant 5.000000e-01 : f32
    %18 = vector.broadcast %cst_5 : f32 to vector<64x256xf32>
    %19 = arith.mulf %18, %15 : vector<64x256xf32>
    %20 = math.tanh %19 : vector<64x256xf32>
    %cst_6 = arith.constant 1.000000e+00 : f32
    %21 = vector.broadcast %cst_6 : f32 to vector<64x256xf32>
    %22 = arith.addf %20, %21 : vector<64x256xf32>
    %23 = arith.mulf %17, %22 : vector<64x256xf32>
    %c0_7 = arith.constant 0 : index
    %c0_8 = arith.constant 0 : index
    %24 = vector.load %arg4[%c0_7, %c0_8] : memref<128x64xf32, #tpu.memory_space<vmem>>, vector<128x64xf32>
    %cst_9 = arith.constant dense<0.000000e+00> : vector<128x256xf32>
    %25 = tpu.matmul %24, %23, %cst_9 {dimension_numbers = #tpu.dot_dimension_numbers<[1], [0], [0], [1], [0, 0, 1, 1], [], []>} : vector<128x64xf32>, vector<64x256xf32>, vector<128x256xf32> -> vector<128x256xf32>
    %c0_10 = arith.constant 0 : index
    %c0_11 = arith.constant 0 : index
    %26 = vector.load %arg5[%c0_10, %c0_11] : memref<128x1xf32, #tpu.memory_space<vmem>>, vector<128x1xf32>
    %27 = vector.broadcast %26 : vector<128x1xf32> to vector<128x256xf32>
    %28 = arith.addf %25, %27 : vector<128x256xf32>
    %cst_12 = arith.constant 5.000000e-01 : f32
    %29 = vector.broadcast %cst_12 : f32 to vector<128x256xf32>
    %30 = arith.mulf %29, %28 : vector<128x256xf32>
    %cst_13 = arith.constant 5.000000e-01 : f32
    %31 = vector.broadcast %cst_13 : f32 to vector<128x256xf32>
    %32 = arith.mulf %31, %28 : vector<128x256xf32>
    %33 = math.tanh %32 : vector<128x256xf32>
    %cst_14 = arith.constant 1.000000e+00 : f32
    %34 = vector.broadcast %cst_14 : f32 to vector<128x256xf32>
    %35 = arith.addf %33, %34 : vector<128x256xf32>
    %36 = arith.mulf %30, %35 : vector<128x256xf32>
    %c0_15 = arith.constant 0 : index
    %c0_16 = arith.constant 0 : index
    %37 = vector.load %arg6[%c0_15, %c0_16] : memref<64x128xf32, #tpu.memory_space<vmem>>, vector<64x128xf32>
    %cst_17 = arith.constant dense<0.000000e+00> : vector<64x256xf32>
    %38 = tpu.matmul %37, %36, %cst_17 {dimension_numbers = #tpu.dot_dimension_numbers<[1], [0], [0], [1], [0, 0, 1, 1], [], []>} : vector<64x128xf32>, vector<128x256xf32>, vector<64x256xf32> -> vector<64x256xf32>
    %c0_18 = arith.constant 0 : index
    %c0_19 = arith.constant 0 : index
    %39 = vector.load %arg7[%c0_18, %c0_19] : memref<64x1xf32, #tpu.memory_space<vmem>>, vector<64x1xf32>
    %40 = vector.broadcast %39 : vector<64x1xf32> to vector<64x256xf32>
    %41 = arith.addf %38, %40 : vector<64x256xf32>
    %cst_20 = arith.constant 5.000000e-01 : f32
    %42 = vector.broadcast %cst_20 : f32 to vector<64x256xf32>
    %43 = arith.mulf %42, %41 : vector<64x256xf32>
    %cst_21 = arith.constant 5.000000e-01 : f32
    %44 = vector.broadcast %cst_21 : f32 to vector<64x256xf32>
    %45 = arith.mulf %44, %41 : vector<64x256xf32>
    %46 = math.tanh %45 : vector<64x256xf32>
    %cst_22 = arith.constant 1.000000e+00 : f32
    %47 = vector.broadcast %cst_22 : f32 to vector<64x256xf32>
    %48 = arith.addf %46, %47 : vector<64x256xf32>
    %49 = arith.mulf %43, %48 : vector<64x256xf32>
    %c0_23 = arith.constant 0 : index
    %c0_24 = arith.constant 0 : index
    %50 = vector.load %arg8[%c0_23, %c0_24] : memref<3x64xf32, #tpu.memory_space<vmem>>, vector<3x64xf32>
    %cst_25 = arith.constant dense<0.000000e+00> : vector<3x256xf32>
    %51 = tpu.matmul %50, %49, %cst_25 {dimension_numbers = #tpu.dot_dimension_numbers<[1], [0], [0], [1], [0, 0, 1, 1], [], []>} : vector<3x64xf32>, vector<64x256xf32>, vector<3x256xf32> -> vector<3x256xf32>
    %c0_26 = arith.constant 0 : index
    %c0_27 = arith.constant 0 : index
    %52 = vector.load %arg9[%c0_26, %c0_27] : memref<3x1xf32, #tpu.memory_space<vmem>>, vector<3x1xf32>
    %53 = vector.broadcast %52 : vector<3x1xf32> to vector<3x256xf32>
    %54 = arith.addf %51, %53 : vector<3x256xf32>
    %c0_28 = arith.constant 0 : index
    %c0_29 = arith.constant 0 : index
    %55 = vector.load %arg10[%c0_28, %c0_29] : memref<3x256xf32, #tpu.memory_space<vmem>>, vector<3x256xf32>
    tpu.vector_store %arg10[%c0_28, %c0_29], %54 {strides = array<i32>} : memref<3x256xf32, #tpu.memory_space<vmem>>, vector<3x256xf32>,
    return
  }
  func.func @transform_0(%arg0: i32) -> (i32, i32) {
    %c0_i32 = arith.constant 0 : i32
    %c0_i32_0 = arith.constant 0 : i32
    return %c0_i32, %arg0 : i32, i32
  }
  func.func @transform_1(%arg0: i32) -> (i32, i32) {
    %c0_i32 = arith.constant 0 : i32
    %c0_i32_0 = arith.constant 0 : i32
    %c0_i32_1 = arith.constant 0 : i32
    return %c0_i32, %c0_i32_0 : i32, i32
  }
  func.func @transform_2(%arg0: i32) -> (i32, i32) {
    %c0_i32 = arith.constant 0 : i32
    %c0_i32_0 = arith.constant 0 : i32
    %c0_i32_1 = arith.constant 0 : i32
    return %c0_i32, %c0_i32_0 : i32, i32
  }
  func.func @transform_3(%arg0: i32) -> (i32, i32) {
    %c0_i32 = arith.constant 0 : i32
    %c0_i32_0 = arith.constant 0 : i32
    %c0_i32_1 = arith.constant 0 : i32
    return %c0_i32, %c0_i32_0 : i32, i32
  }
  func.func @transform_4(%arg0: i32) -> (i32, i32) {
    %c0_i32 = arith.constant 0 : i32
    %c0_i32_0 = arith.constant 0 : i32
    %c0_i32_1 = arith.constant 0 : i32
    return %c0_i32, %c0_i32_0 : i32, i32
  }
  func.func @transform_5(%arg0: i32) -> (i32, i32) {
    %c0_i32 = arith.constant 0 : i32
    %c0_i32_0 = arith.constant 0 : i32
    %c0_i32_1 = arith.constant 0 : i32
    return %c0_i32, %c0_i32_0 : i32, i32
  }
  func.func @transform_6(%arg0: i32) -> (i32, i32) {
    %c0_i32 = arith.constant 0 : i32
    %c0_i32_0 = arith.constant 0 : i32
    %c0_i32_1 = arith.constant 0 : i32
    return %c0_i32, %c0_i32_0 : i32, i32
  }
  func.func @transform_7(%arg0: i32) -> (i32, i32) {
    %c0_i32 = arith.constant 0 : i32
    %c0_i32_0 = arith.constant 0 : i32
    %c0_i32_1 = arith.constant 0 : i32
    return %c0_i32, %c0_i32_0 : i32, i32
  }
  func.func @transform_8(%arg0: i32) -> (i32, i32) {
    %c0_i32 = arith.constant 0 : i32
    %c0_i32_0 = arith.constant 0 : i32
    %c0_i32_1 = arith.constant 0 : i32
    return %c0_i32, %c0_i32_0 : i32, i32
  }
  func.func @transform_9(%arg0: i32) -> (i32, i32) {
    %c0_i32 = arith.constant 0 : i32
    %c0_i32_0 = arith.constant 0 : i32
    return %c0_i32, %arg0 : i32, i32
  }
}

</mosaic_0001>

<bundles_post_ra>
// kernel: _surface_mlp_forward_impl.1
= control target key start
LH: loop header
LB: loop body
LE: loop exit
PB: predicated region body
PF: predicated region fallthrough
CT: control target
= control target key end

     0   :  { %v1292_v2 = vmov 1   ;;  %v1293_v3 = vmov 0   ;;  %s1886_s0 = inlined_call_operand.vmem [shape: f32[2,256], index: 0, kind: input, shape index: {}]   ;;  %s1887_s1 = inlined_call_operand.vmem [shape: f32[64,2], index: 1, kind: input, shape index: {}]   ;;  %s1888_s2 = inlined_call_operand.vmem [shape: f32[64,1], index: 2, kind: input, shape index: {}]   ;;  %s1889_s3 = inlined_call_operand.vmem [shape: f32[128,64], index: 3, kind: input, shape index: {}]   ;;  %s1890_s4 = inlined_call_operand.vmem [shape: f32[128,1], index: 4, kind: input, shape index: {}]   ;;  %s1891_s5 = inlined_call_operand.vmem [shape: f32[64,128], index: 5, kind: input, shape index: {}]   ;;  %s1892_s6 = inlined_call_operand.vmem [shape: f32[64,1], index: 6, kind: input, shape index: {}]   ;;  %s1893_s7 = inlined_call_operand.vmem [shape: f32[3,64], index: 7, kind: input, shape index: {}]   ;;  %s1894_s8 = inlined_call_operand.vmem [shape: f32[3,1], index: 8, kind: input, shape index: {}]   ;;  %s1895_s9 = inlined_call_operand.hbm [shape: f32[3,256], index: 9, kind: output, shape index: {}]  }
   0x1   :  { %v41_v0 = vld [vmem:[%s1887_s1 + $0x38] sm:$0xff]  ;;  %v40_v1 = vld [vmem:[%s1887_s1 + $0x30] sm:$0xff]  ;;  %1131 = vset.pattern.permute.xlu0 %v1292_v2  ;;  %1132 = vset.pattern.permute.xlu1 %v1293_v3  ;;  %v39_v4 = vld [vmem:[%s1887_s1 + $0x28] sm:$0xff] }
   0x2   :  { %146 = vperm.xlu0 %1131, %v41_v0   ;;  %74 = vperm.xlu1 %1132, %v40_v1   ;;  %v36_v5 = vld [vmem:[%s1887_s1 + $0x10] sm:$0xff]  ;;  %v35_v6 = vld [vmem:[%s1887_s1 + $0x8] sm:$0xff]  ;;  %v206_v7 = vld [vmem:[%s1888_s2 + $0x38] sm:$0xff] }
   0x6   :  { %1133 = vset.pattern.permute.xlu1 %v1292_v2  ;;  %138 = vperm.xlu0 %1131, %v39_v4  }
   0x7   :  { %142 = vperm.xlu1 %1133, %v40_v1  }
   0xa   :  { %126 = vperm.xlu0 %1131, %v36_v5  }
   0xb   :  { %1134 = vset.pattern.permute.xlu1 %v1293_v3 }
   0xc   :  { %69 = vperm.xlu1 %1134, %v39_v4  }
   0xe   :  { %122 = vperm.xlu0 %1131, %v35_v6  }
   0xf   :  { %14 = vsyncpa [#allocation3], 0  ;;  %v38_v8 = vld [vmem:[%s1887_s1 + $0x20] sm:$0xff]  ;;  %v205_v9 = vld [vmem:[%s1888_s2 + $0x30] sm:$0xff]  ;;  %v1294_v34 = vmov 0.0   ;;  %v83_v44 = vlaneseq  ;;  %vm439_vm0 = vcmask 523264  }
  0x10   :  { %244 = vperm.xlu1 %1134, %v206_v7   ;;  %v37_v10 = vld [vmem:[%s1887_s1 + $0x18] sm:$0xff]  ;;  %v204_v11 = vld [vmem:[%s1888_s2 + $0x28] sm:$0xff]  ;;  %v34_v12 = vld [vmem:[%s1887_s1] sm:$0xff]  ;;  %552 = vmatprep.mubr.f32.mxu0 %v1294_v34  ;;  %s1295_s19 = smov [#allocation2]  }
  0x11   :  { %v200_v13 = vld [vmem:[%s1888_s2 + $0x8] sm:$0xff]  ;;  %v203_v14 = vld [vmem:[%s1888_s2 + $0x20] sm:$0xff]  ;;  %v358_v15 = vld [vmem:[%s1890_s4 + $0x78] sm:$0xff]  ;;  %897 = vmatprep.mubr.f32.mxu1 %v1294_v34  ;;  %v84_v47 = vshrl.u32 %v83_v44, 7  ;;  %s1102_s20 = sshll.u32 %s1295_s19, 4  ;;  %s1103_s20 = int_to_ptr.vmem [resolvable:$true] %s1102_s20 }
  0x12   :  { %1139 = vset.pattern.permute.xlu0 %v1293_v3  ;;  %v356_v16 = vld [vmem:[%s1890_s4 + $0x68] sm:$0xff]  ;;  %v202_v17 = vld [vmem:[%s1888_s2 + $0x18] sm:$0xff]  ;;  %v201_v20 = vld [vmem:[%s1888_s2 + $0x10] sm:$0xff]  ;;  %p1275_p1 = scmp.lt.s32.totalorder %s1103_s20, %s1103_s20 }
  0x13   :  { %79 = vperm.xlu0 %1139, %v41_v0   ;;  %v354_v18 = vld [vmem:[%s1890_s4 + $0x58] sm:$0xff]  ;;  %v352_v19 = vld [vmem:[%s1890_s4 + $0x48] sm:$0xff]  ;;  %v199_v22 = vld [vmem:[%s1888_s2] sm:$0xff]  ;;  %v151_v50 = vsub.s32 1, %v84_v47  ;;  %v155_v51 = vsub.s32 3, %v84_v47  ;;  %v85_v52 = vsub.s32 0, %v84_v47 }
  0x14   :  { %1135 = vset.pattern.permute.xlu1 %v1292_v2  ;;  %v350_v21 = vld [vmem:[%s1890_s4 + $0x38] sm:$0xff]  ;;  %v348_v23 = vld [vmem:[%s1890_s4 + $0x28] sm:$0xff]  ;;  %v357_v24 = vld [vmem:[%s1890_s4 + $0x70] sm:$0xff]  ;;  %v89_v53 = vsub.s32 2, %v84_v47 }
  0x15   :  { %134 = vperm.xlu1 %1135, %v38_v8   ;;  %v346_v25 = vld [vmem:[%s1890_s4 + $0x18] sm:$0xff]  ;;  %v355_v26 = vld [vmem:[%s1890_s4 + $0x60] sm:$0xff]  ;;  %v344_v27 = vld [vmem:[%s1890_s4 + $0x8] sm:$0xff] }
  0x16   :  { %v353_v28 = vld [vmem:[%s1890_s4 + $0x50] sm:$0xff]  ;;  %v792_v29 = vld [vmem:[%s1892_s6 + $0x38] sm:$0xff]  ;;  %v351_v30 = vld [vmem:[%s1890_s4 + $0x40] sm:$0xff] }
  0x17   :  { %64 = vperm.xlu0 %1139, %v38_v8   ;;  %v790_v31 = vld [vmem:[%s1892_s6 + $0x28] sm:$0xff]  ;;  %v349_v32 = vld [vmem:[%s1890_s4 + $0x30] sm:$0xff]  ;;  %v788_v33 = vld [vmem:[%s1892_s6 + $0x18] sm:$0xff] }
  0x18   :  { %v347_v35 = vld [vmem:[%s1890_s4 + $0x20] sm:$0xff]  ;;  %v786_v36 = vld [vmem:[%s1892_s6 + $0x8] sm:$0xff]  ;;  %v345_v37 = vld [vmem:[%s1890_s4 + $0x10] sm:$0xff] }
  0x19   :  { %1136 = vset.pattern.permute.xlu1 %v1293_v3  ;;  %v1011_v38 = vld [vmem:[%s1894_s8] sm:$0x7]  ;;  %v791_v40 = vld [vmem:[%s1892_s6 + $0x30] sm:$0xff]  ;;  %s1270_s8 = scalar_lea.vmem %s1103_s20, 128 }
  0x1a   :  { %239 = vperm.xlu1 %1136, %v205_v9   ;;  %v343_v39 = vld [vmem:[%s1890_s4] sm:$0xff]  ;;  %v787_v42 = vld [vmem:[%s1892_s6 + $0x10] sm:$0xff]  ;;  %p1271_p0 = scmp.ne.s32.totalorder %s1103_s20, %s1270_s8  ;;  %p1276_p2 = scmp.lt.s32.totalorder %s1270_s8, %s1270_s8 }
  0x1b   :  { %59 = vperm.xlu0 %1139, %v37_v10   ;;  %v789_v41 = vld [vmem:[%s1892_s6 + $0x20] sm:$0xff] }
  0x1c   :  { %v785_v43 = vld [vmem:[%s1892_s6] sm:$0xff]  ;;  %p1277_p3 = por %p1276_p2, %p1275_p1 }
  0x1d   :  { %v33_v55 = vld [vmem:[%s1886_s0] sm:$0xf] }
  0x1e   :  { %1137 = vset.pattern.permute.xlu1 %v1292_v2  ;;  %v152_v56 = vrot.slane %v33_v55, %v151_v50  ;;  %v156_v57 = vrot.slane %v33_v55, %v155_v51  ;;  %v86_v59 = vrot.slane %v33_v55, %v85_v52  ;;  %v90_v60 = vrot.slane %v33_v55, %v89_v53  ;;  %p1278_p4 = pnand %p1277_p3, %p1271_p0 }
  0x1f   :  { %130 = vperm.xlu1 %1137, %v37_v10   ;;  %234 = vperm.xlu0 %1139, %v204_v11  }
  0x20   :  { %v1478_v62 = vrot.slane %v152_v56, %v151_v50  ;;  %v1480_v63 = vrot.slane %v156_v57, %v151_v50  ;;  %v1482_v1 = vrot.slane %v86_v59, %v85_v52 }
  0x23   :  { %1138 = vset.pattern.permute.xlu1 %v1293_v3  ;;  %44 = vperm.xlu0 %1139, %v34_v12  }
  0x24   :  { %54 = vperm.xlu1 %1138, %v36_v5  }
  0x27   :  { %214 = vperm.xlu0 %1139, %v200_v13  }
  0x28   :  { %229 = vperm.xlu1 %1138, %v203_v14  }
  0x2b   :  { %436 = vperm.xlu0 %1139, %v358_v15  }
  0x2c   :  { %49 = vperm.xlu1 %1138, %v35_v6  }
  0x2f   :  { %426 = vperm.xlu0 %1139, %v356_v16  }
  0x30   :  { %224 = vperm.xlu1 %1138, %v202_v17  }
  0x33   :  { %416 = vperm.xlu0 %1139, %v354_v18  }
  0x34   :  { %1140 = vset.pattern.permute.xlu1 %v1292_v2  ;;  %v1484_v2 = vrot.slane %v90_v60, %v85_v52 }
  0x35   :  { %118 = vperm.xlu1 %1140, %v34_v12  }
  0x37   :  { %406 = vperm.xlu0 %1139, %v352_v19  }
  0x39   :  { %1141 = vset.pattern.permute.xlu1 %v1293_v3 }
  0x3a   :  { %219 = vperm.xlu1 %1141, %v201_v20  }
  0x3b   :  { %396 = vperm.xlu0 %1139, %v350_v21  }
  0x3e   :  { %209 = vperm.xlu1 %1141, %v199_v22  }
  0x3f   :  { %386 = vperm.xlu0 %1139, %v348_v23  }
  0x42   :  { %431 = vperm.xlu1 %1141, %v357_v24  }
  0x43   :  { %376 = vperm.xlu0 %1139, %v346_v25  }
  0x46   :  { %421 = vperm.xlu1 %1141, %v355_v26  }
  0x47   :  { %366 = vperm.xlu0 %1139, %v344_v27  }
  0x4a   :  { %411 = vperm.xlu1 %1141, %v353_v28  }
  0x4b   :  { %830 = vperm.xlu0 %1139, %v792_v29  }
  0x4e   :  { %401 = vperm.xlu1 %1141, %v351_v30  }
  0x4f   :  { %820 = vperm.xlu0 %1139, %v790_v31  }
  0x52   :  { %391 = vperm.xlu1 %1141, %v349_v32  }
  0x53   :  { %810 = vperm.xlu0 %1139, %v788_v33  }
  0x56   :  { %381 = vperm.xlu1 %1141, %v347_v35  }
  0x57   :  { %800 = vperm.xlu0 %1139, %v786_v36  }
  0x5a   :  { %371 = vperm.xlu1 %1141, %v345_v37  }
  0x5b   :  { %1014 = vperm.xlu0 %1139, %v1011_v38  }
  0x5e   :  { %361 = vperm.xlu1 %1141, %v343_v39  }
  0x62   :  { %825 = vperm.xlu1 %1141, %v791_v40  }
  0x66   :  { %815 = vperm.xlu1 %1141, %v789_v41  }
  0x6a   :  { %805 = vperm.xlu1 %1141, %v787_v42  }
  0x6e   :  { %795 = vperm.xlu1 %1141, %v785_v43  }
  0x7d   :  { %v75_v45 = vpop.permute.xlu1 %74  ;;  %v147_v46 = vpop.permute.xlu0 %146 }
  0x7e   :  { %v181_v3 = vmul.f32 %v1478_v62, %v147_v46  ;;  %v182_v4 = vmul.f32 %v1480_v63, %v147_v46  ;;  %v113_v13 = vmul.f32 %v1482_v1, %v75_v45  ;;  %v114_v14 = vmul.f32 %v1484_v2, %v75_v45 }
  0x81   :  { %v139_v48 = vpop.permute.xlu0 %138 }
  0x82   :  { %v143_v49 = vpop.permute.xlu1 %142  ;;  %v177_v20 = vmul.f32 %v1478_v62, %v139_v48  ;;  %v178_v25 = vmul.f32 %v1480_v63, %v139_v48 }
  0x83   :  { %v179_v8 = vmul.f32 %v1478_v62, %v143_v49  ;;  %v180_v9 = vmul.f32 %v1480_v63, %v143_v49 }
  0x85   :  { %v1471_v54 = vpop.permute.xlu0 %126  ;;  %v195_v18 = vadd.f32 %v179_v8, %v113_v13  ;;  %v196_v19 = vadd.f32 %v180_v9, %v114_v14 }
  0x87   :  { %v70_v58 = vpop.permute.xlu1 %69 }
  0x88   :  { %v111_v21 = vmul.f32 %v1482_v1, %v70_v58  ;;  %v112_v26 = vmul.f32 %v1484_v2, %v70_v58 }
  0x89   :  { %v1476_v61 = vpop.permute.xlu0 %122 }
  0x8a   :  { %v193_v32 = vadd.f32 %v177_v20, %v111_v21  ;;  %v194_v36 = vadd.f32 %v178_v25, %v112_v26 }
  0x8b   :  { %v245_v0 = vpop.permute.xlu1 %244 }
  0x8e   :  { %v80_v5 = vpop.permute.xlu0 %79 }
  0x8f   :  { %v115_v6 = vmul.f32 %v1482_v1, %v80_v5  ;;  %v116_v7 = vmul.f32 %v1484_v2, %v80_v5 }
  0x90   :  { %v135_v10 = vpop.permute.xlu1 %134 }
  0x91   :  { %v197_v11 = vadd.f32 %v181_v3, %v115_v6  ;;  %v198_v12 = vadd.f32 %v182_v4, %v116_v7  ;;  %v175_v44 = vmul.f32 %v1478_v62, %v135_v10  ;;  %v176_v45 = vmul.f32 %v1480_v63, %v135_v10 }
  0x92   :  { %v65_v15 = vpop.permute.xlu0 %64  ;;  %v170_v7 = vmul.f32 %v1480_v63, %v1476_v61 }
  0x93   :  { %v262_v16 = vadd.f32 %v245_v0, %v198_v12  ;;  %v261_v17 = vadd.f32 %v245_v0, %v197_v11  ;;  %v109_v40 = vmul.f32 %v1482_v1, %v65_v15  ;;  %v110_v41 = vmul.f32 %v1484_v2, %v65_v15 }
  0x95   :  { %v240_v22 = vpop.permute.xlu1 %239  ;;  %v278_v23 = vmul.f32 0.5, %v262_v16  ;;  %v277_v24 = vmul.f32 0.5, %v261_v17  ;;  %v191_v46 = vadd.f32 %v175_v44, %v109_v40  ;;  %v192_v47 = vadd.f32 %v176_v45, %v110_v41 }
  0x96   :  { %v259_v27 = vadd.f32 %v240_v22, %v195_v18  ;;  %v260_v28 = vadd.f32 %v240_v22, %v196_v19  ;;  %v60_v29 = vpop.permute.xlu0 %59  ;;  %v169_v16 = vmul.f32 %v1478_v62, %v1476_v61  ;;  %v172_v40 = vmul.f32 %v1480_v63, %v1471_v54 }
  0x97   :  { %1142 = vtanh.f32 %v278_v23  ;;  %v107_v53 = vmul.f32 %v1482_v1, %v60_v29  ;;  %v108_v55 = vmul.f32 %v1484_v2, %v60_v29 }
  0x98   :  { %v275_v30 = vmul.f32 0.5, %v259_v27  ;;  %v276_v31 = vmul.f32 0.5, %v260_v28  ;;  %1144 = vtanh.f32 %v277_v24 }
  0x9a   :  { %1146 = vtanh.f32 %v275_v30  ;;  %v131_v33 = vpop.permute.xlu1 %130  ;;  %v235_v35 = vpop.permute.xlu0 %234 }
  0x9b   :  { %1148 = vtanh.f32 %v276_v31  ;;  %v257_v37 = vadd.f32 %v235_v35, %v193_v32  ;;  %v258_v38 = vadd.f32 %v235_v35, %v194_v36  ;;  %v173_v56 = vmul.f32 %v1478_v62, %v131_v33 }
  0x9c   :  { %v174_v58 = vmul.f32 %v1480_v63, %v131_v33 }
  0x9d   :  { %v273_v39 = vmul.f32 0.5, %v257_v37  ;;  %v274_v42 = vmul.f32 0.5, %v258_v38  ;;  %v189_v14 = vadd.f32 %v173_v56, %v107_v53  ;;  %v171_v38 = vmul.f32 %v1478_v62, %v1471_v54 }
  0x9e   :  { %v45_v8 = vpop.permute.xlu0 %44  ;;  %v190_v15 = vadd.f32 %v174_v58, %v108_v55 }
  0x9f   :  { %1150 = vtanh.f32 %v273_v39  ;;  %v55_v43 = vpop.permute.xlu1 %54 }
  0xa0   :  { %1152 = vtanh.f32 %v274_v42  ;;  %v105_v61 = vmul.f32 %v1482_v1, %v55_v43  ;;  %v106_v36 = vmul.f32 %v1484_v2, %v55_v43 }
  0xa2   :  { %v215_v27 = vpop.permute.xlu0 %214  ;;  %v187_v45 = vadd.f32 %v171_v38, %v105_v61  ;;  %v188_v43 = vadd.f32 %v172_v40, %v106_v36  ;;  %v333_v61 = vld [vmem:[%s1889_s3 + $0x30] sm:$0xff]  ;;  %v334_v36 = vld [vmem:[%s1889_s3 + $0x38] sm:$0xff]  ;;  %v339_v40 = vld [vmem:[%s1889_s3 + $0x60] sm:$0xff] }
  0xa3   :  { %v230_v48 = vpop.permute.xlu1 %229  ;;  %v338_v38 = vld [vmem:[%s1889_s3 + $0x58] sm:$0xff] }
  0xa4   :  { %v1143_v49 = vpop.eup %1142  ;;  %v255_v50 = vadd.f32 %v230_v48, %v191_v46  ;;  %v256_v51 = vadd.f32 %v230_v48, %v192_v47 }
  0xa5   :  { %v1145_v52 = vpop.eup %1144  ;;  %v310_v57 = vadd.f32 1.0, %v1143_v49 }
  0xa6   :  { %v1506_v59 = vmul.f32 0.5, %v255_v50  ;;  %v1508_v60 = vmul.f32 0.5, %v256_v51  ;;  %v309_v0 = vadd.f32 1.0, %v1145_v52  ;;  %v102_v50 = vmul.f32 %v1484_v2, %v45_v8 }
  0xa7   :  { %v1147_v3 = vpop.eup %1146  ;;  %v50_v4 = vpop.permute.xlu1 %49  ;;  %v326_v5 = vmul.f32 %v310_v57, %v278_v23 }
  0xa8   :  { %v1149_v6 = vpop.eup %1148  ;;  %1154 = vtanh.f32 %v1506_v59  ;;  %v104_v9 = vmul.f32 %v1484_v2, %v50_v4  ;;  %v325_v10 = vmul.f32 %v309_v0, %v277_v24  ;;  %v103_v11 = vmul.f32 %v1482_v1, %v50_v4 }
  0xa9   :  { %1156 = vtanh.f32 %v1508_v60  ;;  %504 = vmatprep.subr.mxu0 %v326_v5  ;;  %v308_v12 = vadd.f32 1.0, %v1149_v6  ;;  %v307_v13 = vadd.f32 1.0, %v1147_v3 }
  0xaa   :  { %505 = vmatpush1.msra.mxu0 %v325_v10  ;;  %v186_v17 = vadd.f32 %v170_v7, %v104_v9  ;;  %v185_v25 = vadd.f32 %v169_v16, %v103_v11 }
  0xab   :  { %v225_v18 = vpop.permute.xlu1 %224  ;;  %v324_v19 = vmul.f32 %v308_v12, %v276_v31  ;;  %v323_v20 = vmul.f32 %v307_v13, %v275_v30 }
  0xac   :  { %v1151_v21 = vpop.eup %1150  ;;  %v253_v22 = vadd.f32 %v225_v18, %v189_v14  ;;  %v254_v23 = vadd.f32 %v225_v18, %v190_v15  ;;  %v250_v33 = vadd.f32 %v215_v27, %v186_v17  ;;  %v249_v37 = vadd.f32 %v215_v27, %v185_v25  ;;  %v327_v27 = vld [vmem:[%s1889_s3] sm:$0xff] }
  0xad   :  { %v1153_v24 = vpop.eup %1152  ;;  %506 = vmatprep.subr.mxu0 %v324_v19  ;;  %v305_v26 = vadd.f32 1.0, %v1151_v21 }
  0xae   :  { %v269_v28 = vmul.f32 0.5, %v253_v22  ;;  %v270_v29 = vmul.f32 0.5, %v254_v23  ;;  %507 = vmatpush1.msra.mxu0 %v323_v20  ;;  %v306_v32 = vadd.f32 1.0, %v1153_v24  ;;  %v265_v48 = vmul.f32 0.5, %v249_v37  ;;  %v337_v37 = vld [vmem:[%s1889_s3 + $0x50] sm:$0xff] }
  0xaf   :  { %v321_v35 = vmul.f32 %v305_v26, %v273_v39  ;;  %v266_v39 = vmul.f32 0.5, %v250_v33  ;;  %v331_v33 = vld [vmem:[%s1889_s3 + $0x20] sm:$0xff] }
  0xb0   :  { %1158 = vtanh.f32 %v269_v28  ;;  %v119_v30 = vpop.permute.xlu1 %118  ;;  %v322_v31 = vmul.f32 %v306_v32, %v274_v42  ;;  %v101_v42 = vmul.f32 %v1482_v1, %v45_v8  ;;  %v330_v32 = vld [vmem:[%s1889_s3 + $0x18] sm:$0xff] }
  0xb1   :  { %1160 = vtanh.f32 %v270_v29  ;;  %v167_v41 = vmul.f32 %v1478_v62, %v119_v30  ;;  %v168_v44 = vmul.f32 %v1480_v63, %v119_v30  ;;  %v335_v30 = vld [vmem:[%s1889_s3 + $0x40] sm:$0xff] }
  0xb2   :  { %508 = vmatprep.subr.mxu0 %v322_v31  ;;  %1162 = vtanh.f32 %v266_v39  ;;  %v336_v31 = vld [vmem:[%s1889_s3 + $0x48] sm:$0xff] }
  0xb3   :  { %509 = vmatpush1.msra.mxu0 %v321_v35  ;;  %v183_v53 = vadd.f32 %v167_v41, %v101_v42  ;;  %v184_v57 = vadd.f32 %v168_v44, %v102_v50  ;;  %1164 = vtanh.f32 %v265_v48  ;;  %v332_v35 = vld [vmem:[%s1889_s3 + $0x28] sm:$0xff]  ;;  %v342_v44 = vld [vmem:[%s1889_s3 + $0x78] sm:$0xff] }
  0xb4   :  { %v340_v41 = vld [vmem:[%s1889_s3 + $0x68] sm:$0xff] }
  0xb5   :  { %v1155_v46 = vpop.eup %1154  ;;  %v220_v47 = vpop.permute.xlu1 %219 }
  0xb6   :  { %v1157_v49 = vpop.eup %1156  ;;  %v251_v51 = vadd.f32 %v220_v47, %v187_v45  ;;  %v252_v52 = vadd.f32 %v220_v47, %v188_v43  ;;  %v303_v54 = vadd.f32 1.0, %v1155_v46 }
  0xb7   :  { %v304_v55 = vadd.f32 1.0, %v1157_v49 }
  0xb8   :  { %v267_v62 = vmul.f32 0.5, %v251_v51  ;;  %v268_v56 = vmul.f32 0.5, %v252_v52  ;;  %v319_v63 = vmul.f32 %v303_v54, %v1506_v59 }
  0xb9   :  { %v210_v58 = vpop.permute.xlu1 %209  ;;  %v320_v0 = vmul.f32 %v304_v55, %v1508_v60 }
  0xba   :  { %1166 = vtanh.f32 %v267_v62  ;;  %v247_v1 = vadd.f32 %v210_v58, %v183_v53  ;;  %v248_v3 = vadd.f32 %v210_v58, %v184_v57 }
  0xbb   :  { %1168 = vtanh.f32 %v268_v56  ;;  %510 = vmatprep.subr.mxu0 %v320_v0  ;;  %v437_v0 = vpop.permute.xlu0 %436 }
  0xbc   :  { %v263_v2 = vmul.f32 0.5, %v247_v1  ;;  %v264_v4 = vmul.f32 0.5, %v248_v3  ;;  %511 = vmatpush1.msra.mxu0 %v319_v63 }
  0xbd   :  { %v1159_v5 = vpop.eup %1158  ;;  %v432_v63 = vpop.permute.xlu1 %431 }
  0xbe   :  { %v1161_v6 = vpop.eup %1160  ;;  %1170 = vtanh.f32 %v263_v2  ;;  %v301_v7 = vadd.f32 1.0, %v1159_v5 }
  0xbf   :  { %1172 = vtanh.f32 %v264_v4  ;;  %v302_v8 = vadd.f32 1.0, %v1161_v6  ;;  %v1163_v10 = vpop.eup %1162  ;;  %v427_v5 = vpop.permute.xlu0 %426 }
  0xc0   :  { %v317_v9 = vmul.f32 %v301_v7, %v269_v28  ;;  %v1165_v60 = vpop.eup %1164  ;;  %v298_v15 = vadd.f32 1.0, %v1163_v10  ;;  %v328_v28 = vld [vmem:[%s1889_s3 + $0x8] sm:$0xff] }
  0xc1   :  { %v318_v59 = vmul.f32 %v302_v8, %v270_v29  ;;  %v297_v17 = vadd.f32 1.0, %v1165_v60  ;;  %v329_v29 = vld [vmem:[%s1889_s3 + $0x10] sm:$0xff] }
  0xc2   :  { %v314_v22 = vmul.f32 %v298_v15, %v266_v39  ;;  %v341_v39 = vld [vmem:[%s1889_s3 + $0x70] sm:$0xff] }
  0xc3   :  { %512 = vmatprep.subr.mxu0 %v318_v59  ;;  %v313_v24 = vmul.f32 %v297_v17, %v265_v48  ;;  %v417_v59 = vpop.permute.xlu0 %416 }
  0xc4   :  { %513 = vmatpush1.msra.mxu0 %v317_v9 }
  0xc7   :  { %v1167_v11 = vpop.eup %1166 }
  0xc8   :  { %v1169_v12 = vpop.eup %1168  ;;  %v299_v13 = vadd.f32 1.0, %v1167_v11 }
  0xc9   :  { %v300_v14 = vadd.f32 1.0, %v1169_v12 }
  0xca   :  { %v315_v16 = vmul.f32 %v299_v13, %v267_v62  ;;  %v407_v13 = vpop.permute.xlu0 %406 }
  0xcb   :  { %v1171_v18 = vpop.eup %1170  ;;  %v316_v19 = vmul.f32 %v300_v14, %v268_v56 }
  0xcc   :  { %v1173_v20 = vpop.eup %1172  ;;  %v295_v21 = vadd.f32 1.0, %v1171_v18 }
  0xcd   :  { %514 = vmatprep.subr.mxu0 %v316_v19  ;;  %v296_v23 = vadd.f32 1.0, %v1173_v20 }
  0xce   :  { %515 = vmatpush1.msra.mxu0 %v315_v16  ;;  %v311_v25 = vmul.f32 %v295_v21, %v263_v2  ;;  %v422_v2 = vpop.permute.xlu1 %421  ;;  %v397_v19 = vpop.permute.xlu0 %396 }
  0xcf   :  { %516 = vmatprep.subr.mxu0 %v314_v22  ;;  %v312_v26 = vmul.f32 %v296_v23, %v264_v4 }
  0xd0   :  { %517 = vmatpush1.msra.mxu0 %v313_v24 }
  0xd1   :  { %518 = vmatprep.subr.mxu0 %v312_v26 }
  0xd2   :  { %519 = vmatpush1.msra.mxu0 %v311_v25  ;;  %v412_v8 = vpop.permute.xlu1 %411 }
  0xd3   :  { %1110 = vmatmul.mubr.msk.f32.vlgmr.msra.gmra.mxu0 %vm439_vm0, %v327_v27 }
  0xd4   :  { %558 = vmatprep.mubr.f32.mxu0 %v1294_v34 }
  0xd6   :  { %v402_v11 = vpop.permute.xlu1 %401 }
  0xd7   :  { %1111 = vmatmul.mubr.msk.f32.gmra.mxu0 %vm439_vm0, %v328_v28 }
  0xd8   :  { %564 = vmatprep.mubr.f32.mxu0 %v1294_v34 }
  0xda   :  { %v392_v16 = vpop.permute.xlu1 %391 }
  0xdb   :  { %1112 = vmatmul.mubr.msk.f32.gmra.mxu0 %vm439_vm0, %v329_v29 }
  0xdc   :  { %570 = vmatprep.mubr.f32.mxu0 %v1294_v34 }
  0xde   :  { %v1645_v29 = vpop.permute.xlu1 %381 }
  0xdf   :  { %1113 = vmatmul.mubr.msk.f32.gmra.mxu0 %vm439_vm0, %v330_v32 }
  0xe0   :  { %576 = vmatprep.mubr.f32.mxu0 %v1294_v34 }
  0xe3   :  { %1114 = vmatmul.mubr.msk.f32.gmra.mxu0 %vm439_vm0, %v331_v33 }
  0xe4   :  { %582 = vmatprep.mubr.f32.mxu0 %v1294_v34 }
  0xe7   :  { %1115 = vmatmul.mubr.msk.f32.gmra.mxu0 %vm439_vm0, %v332_v35 }
  0xe8   :  { %588 = vmatprep.mubr.f32.mxu0 %v1294_v34 }
  0xeb   :  { %1116 = vmatmul.mubr.msk.f32.gmra.mxu0 %vm439_vm0, %v333_v61 }
  0xec   :  { %594 = vmatprep.mubr.f32.mxu0 %v1294_v34 }
  0xef   :  { %1117 = vmatmul.mubr.msk.f32.gmra.mxu0 %vm439_vm0, %v334_v36 }
  0xf0   :  { %600 = vmatprep.mubr.f32.mxu0 %v1294_v34 }
  0xf3   :  { %1118 = vmatmul.mubr.msk.f32.gmra.mxu0 %vm439_vm0, %v335_v30 }
  0xf4   :  { %606 = vmatprep.mubr.f32.mxu0 %v1294_v34 }
  0xf7   :  { %1119 = vmatmul.mubr.msk.f32.gmra.mxu0 %vm439_vm0, %v336_v31  ;;  %v387_v31 = vpop.permute.xlu0 %386 }
  0xf8   :  { %612 = vmatprep.mubr.f32.mxu0 %v1294_v34 }
  0xfb   :  { %1120 = vmatmul.mubr.msk.f32.gmra.mxu0 %vm439_vm0, %v337_v37 }
  0xfc   :  { %618 = vmatprep.mubr.f32.mxu0 %v1294_v34 }
  0xff   :  { %1121 = vmatmul.mubr.msk.f32.gmra.mxu0 %vm439_vm0, %v338_v38 }
 0x100   :  { %624 = vmatprep.mubr.f32.mxu0 %v1294_v34 }
 0x103   :  { %1122 = vmatmul.mubr.msk.f32.gmra.mxu0 %vm439_vm0, %v339_v40 }
 0x104   :  { %630 = vmatprep.mubr.f32.mxu0 %v1294_v34 }
 0x107   :  { %1123 = vmatmul.mubr.msk.f32.gmra.mxu0 %vm439_vm0, %v340_v41 }
 0x108   :  { %636 = vmatprep.mubr.f32.mxu0 %v1294_v34 }
 0x10b   :  { %1124 = vmatmul.mubr.msk.f32.gmra.mxu0 %vm439_vm0, %v341_v39 }
 0x10c   :  { %642 = vmatprep.mubr.f32.mxu0 %v1294_v34 }
 0x10f   :  { %1125 = vmatmul.mubr.msk.f32.gmra.mxu0 %vm439_vm0, %v342_v44 }
 0x193   :  { %v1609_v45 = vpop.f32.mrf.mxu0 }
 0x195   :  { %v1611_v43 = vpop.f32.mrf.mxu0 }
 0x197   :  { %v1613_v46 = vpop.f32.mrf.mxu0 }
 0x199   :  { %v1615_v42 = vpop.f32.mrf.mxu0 }
 0x19b   :  { %v1617_v47 = vpop.f32.mrf.mxu0 }
 0x19d   :  { %v1619_v48 = vpop.f32.mrf.mxu0 }
 0x19f   :  { %v1621_v49 = vpop.f32.mrf.mxu0 }
 0x1a1   :  { %v1623_v50 = vpop.f32.mrf.mxu0 }
 0x1a3   :  { %v1625_v51 = vpop.f32.mrf.mxu0 }
 0x1a5   :  { %v1627_v52 = vpop.f32.mrf.mxu0 }
 0x1a7   :  { %v1629_v54 = vpop.f32.mrf.mxu0 }
 0x1a9   :  { %v1631_v53 = vpop.f32.mrf.mxu0 }
 0x1ab   :  { %v1633_v55 = vpop.f32.mrf.mxu0 }
 0x1ad   :  { %v1635_v62 = vpop.f32.mrf.mxu0 }
 0x1af   :  { %v1637_v56 = vpop.f32.mrf.mxu0 }
 0x1b1   :  { %v1639_v57 = vpop.f32.mrf.mxu0 }
 0x1b3   :  { %v602_v58 = vpop.f32.mrf.mxu0 }
 0x1b5   :  { %v604_v1 = vpop.f32.mrf.mxu0 }
 0x1b7   :  { %v608_v3 = vpop.f32.mrf.mxu0 }
 0x1b9   :  { %v610_v4 = vpop.f32.mrf.mxu0 }
 0x1bb   :  { %v614_v6 = vpop.f32.mrf.mxu0 }
 0x1bc   :  { %v615_v44 = vadd.f32 %v614_v6, %v412_v8  ;;  %v377_v6 = vpop.permute.xlu0 %376 }
 0x1bd   :  { %v616_v7 = vpop.f32.mrf.mxu0 }
 0x1be   :  { %v617_v40 = vadd.f32 %v616_v7, %v412_v8  ;;  %v605_v7 = vadd.f32 %v604_v1, %v402_v11  ;;  %v603_v8 = vadd.f32 %v602_v58, %v402_v11  ;;  %v593_v1 = vadd.f32 %v1635_v62, %v392_v16 }
 0x1bf   :  { %v620_v9 = vpop.f32.mrf.mxu0  ;;  %v591_v11 = vadd.f32 %v1633_v55, %v392_v16  ;;  %v585_v55 = vadd.f32 %v1629_v54, %v387_v31  ;;  %v579_v54 = vadd.f32 %v1625_v51, %v1645_v29 }
 0x1c0   :  { %v621_v37 = vadd.f32 %v620_v9, %v417_v59  ;;  %v609_v9 = vadd.f32 %v608_v3, %v407_v13  ;;  %v597_v3 = vadd.f32 %v1637_v56, %v397_v19  ;;  %v587_v56 = vadd.f32 %v1631_v53, %v387_v31 }
 0x1c1   :  { %v622_v10 = vpop.f32.mrf.mxu0  ;;  %v581_v53 = vadd.f32 %v1627_v52, %v1645_v29  ;;  %v1730_v31 = vmul.f32 0.5, %v579_v54 }
 0x1c2   :  { %v623_v61 = vadd.f32 %v622_v10, %v417_v59  ;;  %v1666_v59 = vmul.f32 0.5, %v621_v37  ;;  %v1669_v10 = vmul.f32 0.5, %v617_v40  ;;  %v1702_v16 = vmul.f32 0.5, %v597_v3 }
 0x1c3   :  { %v626_v60 = vpop.f32.mrf.mxu0  ;;  %v1719_v52 = vmul.f32 0.5, %v587_v56 }
 0x1c4   :  { %v627_v32 = vadd.f32 %v626_v60, %v422_v2  ;;  %v1672_v60 = vmul.f32 0.5, %v615_v44 }
 0x1c5   :  { %v628_v12 = vpop.f32.mrf.mxu0 }
 0x1c6   :  { %v629_v26 = vadd.f32 %v628_v12, %v422_v2  ;;  %v611_v2 = vadd.f32 %v610_v4, %v407_v13  ;;  %v599_v4 = vadd.f32 %v1639_v57, %v397_v19  ;;  %v1680_v13 = vmul.f32 0.5, %v609_v9 }
 0x1c7   :  { %v632_v14 = vpop.f32.mrf.mxu0  ;;  %v1688_v57 = vmul.f32 0.5, %v603_v8 }
 0x1c8   :  { %v633_v24 = vadd.f32 %v632_v14, %v427_v5  ;;  %v1655_v41 = vmul.f32 0.5, %v629_v26  ;;  %v1676_v12 = vmul.f32 0.5, %v611_v2  ;;  %v1684_v14 = vmul.f32 0.5, %v605_v7 }
 0x1c9   :  { %v634_v15 = vpop.f32.mrf.mxu0  ;;  %v575_v26 = vadd.f32 %v1623_v50, %v377_v6 }
 0x1ca   :  { %v635_v17 = vadd.f32 %v634_v15, %v427_v5  ;;  %v1652_v38 = vmul.f32 0.5, %v633_v24  ;;  %v372_v5 = vpop.permute.xlu1 %371  ;;  %v1714_v24 = vmul.f32 0.5, %v591_v11 }
 0x1cb   :  { %v638_v18 = vpop.f32.mrf.mxu0  ;;  %v1733_v40 = vmul.f32 0.5, %v575_v26 }
 0x1cc   :  { %v639_v20 = vadd.f32 %v638_v18, %v432_v63  ;;  %v1641_v22 = vmul.f32 0.5, %v635_v17  ;;  %v1695_v17 = vmul.f32 0.5, %v599_v4  ;;  %v367_v18 = vpop.permute.xlu0 %366 }
 0x1cd   :  { %v640_v21 = vpop.f32.mrf.mxu0 }
 0x1ce   :  { %v641_v23 = vadd.f32 %v640_v21, %v432_v63  ;;  %v1647_v33 = vmul.f32 0.5, %v639_v20  ;;  %1174 = vtanh.f32 %v1641_v22  ;;  %v1660_v63 = vmul.f32 0.5, %v627_v32  ;;  %v362_v58 = vpop.permute.xlu1 %361 }
 0x1cf   :  { %v644_v25 = vpop.f32.mrf.mxu0  ;;  %v1692_v15 = vadd.f32 %v1609_v45, %v362_v58  ;;  %v1699_v19 = vadd.f32 %v1611_v43, %v362_v58  ;;  %v561_v45 = vadd.f32 %v1613_v46, %v367_v18  ;;  %v1708_v21 = vmul.f32 0.5, %v593_v1 }
 0x1d0   :  { %v1643_v27 = vmul.f32 0.5, %v641_v23  ;;  %v645_v28 = vadd.f32 %v644_v25, %v437_v0  ;;  %v563_v43 = vadd.f32 %v1615_v42, %v367_v18  ;;  %v569_v46 = vadd.f32 %v1619_v48, %v372_v5 }
 0x1d1   :  { %v646_v35 = vpop.f32.mrf.mxu0  ;;  %v573_v32 = vadd.f32 %v1621_v49, %v377_v6  ;;  %v1723_v42 = vmul.f32 0.5, %v585_v55  ;;  %v1753_v55 = vmul.f32 0.5, %v561_v45  ;;  %v1763_v45 = vmul.f32 0.5, %v1692_v15 }
 0x1d2   :  { %v1650_v36 = vmul.f32 0.5, %v645_v28  ;;  %v647_v30 = vadd.f32 %v646_v35, %v437_v0  ;;  %1176 = vtanh.f32 %v1643_v27  ;;  %v1663_v0 = vmul.f32 0.5, %v623_v61 }
 0x1d3   :  { %v1726_v35 = vmul.f32 0.5, %v581_v53  ;;  %v1737_v7 = vmul.f32 0.5, %v573_v32  ;;  %v1741_v8 = vmul.f32 0.5, %v569_v46 }
 0x1d4   :  { %1178 = vtanh.f32 %v1650_v36  ;;  %v1658_v39 = vmul.f32 0.5, %v647_v30  ;;  %v567_v30 = vadd.f32 %v1617_v47, %v372_v5 }
 0x1d5   :  { %1180 = vtanh.f32 %v1647_v33 }
 0x1d6   :  { %1182 = vtanh.f32 %v1658_v39  ;;  %v1745_v58 = vmul.f32 0.5, %v567_v30 }
 0x1d7   :  { %1184 = vtanh.f32 %v1652_v38 }
 0x1d8   :  { %1186 = vtanh.f32 %v1655_v41 }
 0x1d9   :  { %1188 = vtanh.f32 %v1660_v63 }
 0x1da   :  { %1190 = vtanh.f32 %v1663_v0 }
 0x1db   :  { %1192 = vtanh.f32 %v1666_v59  ;;  %v1175_v62 = vpop.eup %1174 }
 0x1dc   :  { %1194 = vtanh.f32 %v1669_v10  ;;  %v740_v44 = vadd.f32 1.0, %v1175_v62 }
 0x1dd   :  { %1196 = vtanh.f32 %v1672_v60 }
 0x1de   :  { %1198 = vtanh.f32 %v1676_v12  ;;  %v772_v18 = vmul.f32 %v740_v44, %v1641_v22 }
 0x1df   :  { %1200 = vtanh.f32 %v1680_v13  ;;  %v1177_v20 = vpop.eup %1176 }
 0x1e0   :  { %1202 = vtanh.f32 %v1684_v14  ;;  %v742_v48 = vadd.f32 1.0, %v1177_v20 }
 0x1e1   :  { %v1179_v23 = vpop.eup %1178  ;;  %1204 = vtanh.f32 %v1688_v57 }
 0x1e2   :  { %v1181_v25 = vpop.eup %1180  ;;  %1206 = vtanh.f32 %v1695_v17  ;;  %v743_v51 = vadd.f32 1.0, %v1179_v23  ;;  %v774_v3 = vmul.f32 %v742_v48, %v1643_v27  ;;  %v1758_v23 = vmul.f32 0.5, %v1699_v19 }
 0x1e3   :  { %v1183_v28 = vpop.eup %1182  ;;  %1208 = vtanh.f32 %v1702_v16  ;;  %v741_v49 = vadd.f32 1.0, %v1181_v25 }
 0x1e4   :  { %v1185_v29 = vpop.eup %1184  ;;  %1210 = vtanh.f32 %v1708_v21  ;;  %v744_v61 = vadd.f32 1.0, %v1183_v28  ;;  %v775_v47 = vmul.f32 %v743_v51, %v1650_v36  ;;  %v1749_v36 = vmul.f32 0.5, %v563_v43 }
 0x1e5   :  { %v1187_v50 = vpop.eup %1186  ;;  %1212 = vtanh.f32 %v1714_v24  ;;  %v739_v6 = vadd.f32 1.0, %v1185_v29  ;;  %v773_v11 = vmul.f32 %v741_v49, %v1647_v33 }
 0x1e6   :  { %v1189_v37 = vpop.eup %1188  ;;  %1214 = vtanh.f32 %v1719_v52  ;;  %v776_v2 = vmul.f32 %v744_v61, %v1658_v39  ;;  %v738_v4 = vadd.f32 1.0, %v1187_v50 }
 0x1e7   :  { %v1191_v9 = vpop.eup %1190  ;;  %1216 = vtanh.f32 %v1723_v42  ;;  %v737_v39 = vadd.f32 1.0, %v1189_v37  ;;  %v771_v53 = vmul.f32 %v739_v6, %v1652_v38 }
 0x1e8   :  { %v1193_v5 = vpop.eup %1192  ;;  %1218 = vtanh.f32 %v1726_v35  ;;  %833 = vmatprep.subr.mxu1 %v776_v2  ;;  %v736_v62 = vadd.f32 1.0, %v1191_v9  ;;  %v770_v54 = vmul.f32 %v738_v4, %v1655_v41 }
 0x1e9   :  { %v1195_v1 = vpop.eup %1194  ;;  %1220 = vtanh.f32 %v1730_v31  ;;  %834 = vmatpush1.msra.mxu1 %v775_v47  ;;  %v735_v20 = vadd.f32 1.0, %v1193_v5  ;;  %v769_v38 = vmul.f32 %v737_v39, %v1660_v63 }
 0x1ea   :  { %v1197_v56 = vpop.eup %1196  ;;  %1222 = vtanh.f32 %v1733_v40  ;;  %835 = vmatprep.subr.mxu1 %v774_v3  ;;  %v734_v43 = vadd.f32 1.0, %v1195_v1  ;;  %v768_v26 = vmul.f32 %v736_v62, %v1663_v0 }
 0x1eb   :  { %v1199_v27 = vpop.eup %1198  ;;  %1224 = vtanh.f32 %v1737_v7  ;;  %836 = vmatpush1.msra.mxu1 %v773_v11  ;;  %v733_v25 = vadd.f32 1.0, %v1197_v56  ;;  %v767_v15 = vmul.f32 %v735_v20, %v1666_v59 }
 0x1ec   :  { %v1201_v33 = vpop.eup %1200  ;;  %1226 = vtanh.f32 %v1741_v8  ;;  %837 = vmatprep.subr.mxu1 %v772_v18  ;;  %v732_v19 = vadd.f32 1.0, %v1199_v27  ;;  %v766_v63 = vmul.f32 %v734_v43, %v1669_v10 }
 0x1ed   :  { %v1203_v22 = vpop.eup %1202  ;;  %1228 = vtanh.f32 %v1745_v58  ;;  %838 = vmatpush1.msra.mxu1 %v771_v53  ;;  %v731_v41 = vadd.f32 1.0, %v1201_v33  ;;  %v765_v0 = vmul.f32 %v733_v25, %v1672_v60 }
 0x1ee   :  { %v1205_v46 = vpop.eup %1204  ;;  %1230 = vtanh.f32 %v1749_v36  ;;  %839 = vmatprep.subr.mxu1 %v770_v54  ;;  %v730_v51 = vadd.f32 1.0, %v1203_v22  ;;  %v764_v30 = vmul.f32 %v732_v19, %v1676_v12 }
 0x1ef   :  { %v1207_v28 = vpop.eup %1206  ;;  %1232 = vtanh.f32 %v1753_v55  ;;  %840 = vmatpush1.msra.mxu1 %v769_v38  ;;  %v729_v48 = vadd.f32 1.0, %v1205_v46  ;;  %v763_v37 = vmul.f32 %v731_v41, %v1680_v13  ;;  %v783_v41 = vld [vmem:[%s1891_s5 + $0x30] sm:$0xff] }
 0x1f0   :  { %v1209_v32 = vpop.eup %1208  ;;  %1234 = vtanh.f32 %v1758_v23  ;;  %841 = vmatprep.subr.mxu1 %v768_v26  ;;  %v728_v50 = vadd.f32 1.0, %v1207_v28  ;;  %v762_v2 = vmul.f32 %v730_v51, %v1684_v14 }
 0x1f1   :  { %v1211_v29 = vpop.eup %1210  ;;  %1236 = vtanh.f32 %v1763_v45  ;;  %842 = vmatpush1.msra.mxu1 %v767_v15  ;;  %v727_v49 = vadd.f32 1.0, %v1209_v32  ;;  %v761_v60 = vmul.f32 %v729_v48, %v1688_v57  ;;  %v784_v15 = vld [vmem:[%s1891_s5 + $0x38] sm:$0xff] }
 0x1f2   :  { %v1213_v61 = vpop.eup %1212  ;;  %843 = vmatprep.subr.mxu1 %v766_v63  ;;  %v726_v10 = vadd.f32 1.0, %v1211_v29  ;;  %v760_v12 = vmul.f32 %v728_v50, %v1695_v17 }
 0x1f3   :  { %v1215_v59 = vpop.eup %1214  ;;  %844 = vmatpush1.msra.mxu1 %v765_v0  ;;  %v725_v6 = vadd.f32 1.0, %v1213_v61  ;;  %v759_v13 = vmul.f32 %v727_v49, %v1702_v16  ;;  %v826_v49 = vpop.permute.xlu1 %825 }
 0x1f4   :  { %v1217_v44 = vpop.eup %1216  ;;  %845 = vmatprep.subr.mxu1 %v764_v30  ;;  %v724_v5 = vadd.f32 1.0, %v1215_v59  ;;  %v758_v14 = vmul.f32 %v726_v10, %v1708_v21  ;;  %v831_v30 = vpop.permute.xlu0 %830 }
 0x1f5   :  { %v1219_v9 = vpop.eup %1218  ;;  %846 = vmatpush1.msra.mxu1 %v763_v37  ;;  %v723_v3 = vadd.f32 1.0, %v1217_v44  ;;  %v757_v57 = vmul.f32 %v725_v6, %v1714_v24 }
 0x1f6   :  { %v1221_v47 = vpop.eup %1220  ;;  %847 = vmatprep.subr.mxu1 %v762_v2  ;;  %v722_v39 = vadd.f32 1.0, %v1219_v9  ;;  %v756_v17 = vmul.f32 %v724_v5, %v1719_v52 }
 0x1f7   :  { %v1223_v4 = vpop.eup %1222  ;;  %848 = vmatpush1.msra.mxu1 %v761_v60  ;;  %v721_v56 = vadd.f32 1.0, %v1221_v47  ;;  %v755_v16 = vmul.f32 %v723_v3, %v1723_v42  ;;  %v816_v6 = vpop.permute.xlu1 %815 }
 0x1f8   :  { %v1225_v1 = vpop.eup %1224  ;;  %849 = vmatprep.subr.mxu1 %v760_v12  ;;  %v720_v18 = vadd.f32 1.0, %v1223_v4  ;;  %v754_v21 = vmul.f32 %v722_v39, %v1726_v35  ;;  %v821_v10 = vpop.permute.xlu0 %820 }
 0x1f9   :  { %v1227_v11 = vpop.eup %1226  ;;  %850 = vmatpush1.msra.mxu1 %v759_v13  ;;  %v719_v20 = vadd.f32 1.0, %v1225_v1  ;;  %v753_v24 = vmul.f32 %v721_v56, %v1730_v31 }
 0x1fa   :  { %v1229_v62 = vpop.eup %1228  ;;  %851 = vmatprep.subr.mxu1 %v758_v14  ;;  %v718_v33 = vadd.f32 1.0, %v1227_v11  ;;  %v752_v52 = vmul.f32 %v720_v18, %v1733_v40 }
 0x1fb   :  { %v1231_v27 = vpop.eup %1230  ;;  %852 = vmatpush1.msra.mxu1 %v757_v57  ;;  %v717_v54 = vadd.f32 1.0, %v1229_v62  ;;  %v751_v46 = vmul.f32 %v719_v20, %v1737_v7  ;;  %v806_v14 = vpop.permute.xlu1 %805 }
 0x1fc   :  { %v1233_v53 = vpop.eup %1232  ;;  %853 = vmatprep.subr.mxu1 %v756_v17  ;;  %v716_v25 = vadd.f32 1.0, %v1231_v27  ;;  %v750_v19 = vmul.f32 %v718_v33, %v1741_v8  ;;  %v777_v8 = vld [vmem:[%s1891_s5] sm:$0xff]  ;;  %v811_v12 = vpop.permute.xlu0 %810 }
 0x1fd   :  { %v1235_v43 = vpop.eup %1234  ;;  %854 = vmatpush1.msra.mxu1 %v755_v16  ;;  %v715_v38 = vadd.f32 1.0, %v1233_v53  ;;  %v749_v26 = vmul.f32 %v717_v54, %v1745_v58  ;;  %v778_v58 = vld [vmem:[%s1891_s5 + $0x8] sm:$0xff] }
 0x1fe   :  { %v1237_v22 = vpop.eup %1236  ;;  %855 = vmatprep.subr.mxu1 %v754_v21  ;;  %v714_v42 = vadd.f32 1.0, %v1235_v43  ;;  %v748_v31 = vmul.f32 %v716_v25, %v1749_v36  ;;  %v779_v36 = vld [vmem:[%s1891_s5 + $0x10] sm:$0xff] }
 0x1ff   :  { %856 = vmatpush1.msra.mxu1 %v753_v24  ;;  %v713_v35 = vadd.f32 1.0, %v1237_v22  ;;  %v747_v28 = vmul.f32 %v715_v38, %v1753_v55  ;;  %v780_v55 = vld [vmem:[%s1891_s5 + $0x18] sm:$0xff] }
 0x200   :  { %857 = vmatprep.subr.mxu1 %v752_v52  ;;  %v746_v40 = vmul.f32 %v714_v42, %v1758_v23  ;;  %v781_v23 = vld [vmem:[%s1891_s5 + $0x20] sm:$0xff]  ;;  %v801_v43 = vpop.permute.xlu0 %800  ;;  %v796_v52 = vpop.permute.xlu1 %795 }
 0x201   :  { %858 = vmatpush1.msra.mxu1 %v751_v46  ;;  %v745_v7 = vmul.f32 %v713_v35, %v1763_v45  ;;  %v782_v45 = vld [vmem:[%s1891_s5 + $0x28] sm:$0xff] }
 0x202   :  { %859 = vmatprep.subr.mxu1 %v750_v19 }
 0x203   :  { %860 = vmatpush1.msra.mxu1 %v749_v26 }
 0x204   :  { %861 = vmatprep.subr.mxu1 %v748_v31 }
 0x205   :  { %862 = vmatpush1.msra.mxu1 %v747_v28 }
 0x206   :  { %863 = vmatprep.subr.mxu1 %v746_v40 }
 0x207   :  { %864 = vmatpush1.msra.mxu1 %v745_v7 }
 0x208   :  { %898 = vmatmul.mubr.f32.vlgmr.msra.gmra.mxu1 %v777_v8 }
 0x209   :  { %903 = vmatprep.mubr.f32.mxu1 %v1294_v34 }
 0x20c   :  { %904 = vmatmul.mubr.f32.gmra.mxu1 %v778_v58 }
 0x20d   :  { %909 = vmatprep.mubr.f32.mxu1 %v1294_v34 }
 0x210   :  { %910 = vmatmul.mubr.f32.gmra.mxu1 %v779_v36 }
 0x211   :  { %915 = vmatprep.mubr.f32.mxu1 %v1294_v34 }
 0x214   :  { %916 = vmatmul.mubr.f32.gmra.mxu1 %v780_v55 }
 0x215   :  { %921 = vmatprep.mubr.f32.mxu1 %v1294_v34 }
 0x218   :  { %922 = vmatmul.mubr.f32.gmra.mxu1 %v781_v23 }
 0x219   :  { %927 = vmatprep.mubr.f32.mxu1 %v1294_v34 }
 0x21c   :  { %928 = vmatmul.mubr.f32.gmra.mxu1 %v782_v45 }
 0x21d   :  { %933 = vmatprep.mubr.f32.mxu1 %v1294_v34 }
 0x220   :  { %934 = vmatmul.mubr.f32.gmra.mxu1 %v783_v41 }
 0x221   :  { %939 = vmatprep.mubr.f32.mxu1 %v1294_v34 }
 0x224   :  { %940 = vmatmul.mubr.f32.gmra.mxu1 %v784_v15 }
 0x225   :  { %1084 = vmatprep.mubr.f32.mxu1 %v1294_v34 }
 0x2c8   :  { %v899_v32 = vpop.f32.mrf.mxu1 }
 0x2c9   :  { %v900_v35 = vadd.f32 %v899_v32, %v796_v52 }
 0x2ca   :  { %v901_v51 = vpop.f32.mrf.mxu1 }
 0x2cb   :  { %v902_v42 = vadd.f32 %v901_v51, %v796_v52  ;;  %v1859_v7 = vmul.f32 0.5, %v900_v35 }
 0x2cc   :  { %v905_v63 = vpop.f32.mrf.mxu1 }
 0x2cd   :  { %v906_v38 = vadd.f32 %v905_v63, %v801_v43  ;;  %v1856_v40 = vmul.f32 0.5, %v902_v42 }
 0x2ce   :  { %v907_v29 = vpop.f32.mrf.mxu1 }
 0x2cf   :  { %v908_v22 = vadd.f32 %v907_v29, %v801_v43  ;;  %v1853_v28 = vmul.f32 0.5, %v906_v38  ;;  %v1010_v43 = vld [vmem:[%s1893_s7] sm:$0x7] }
 0x2d0   :  { %v911_v48 = vpop.f32.mrf.mxu1 }
 0x2d1   :  { %v912_v54 = vadd.f32 %v911_v48, %v806_v14  ;;  %v1850_v31 = vmul.f32 0.5, %v908_v22 }
 0x2d2   :  { %v913_v0 = vpop.f32.mrf.mxu1 }
 0x2d3   :  { %v914_v53 = vadd.f32 %v913_v0, %v806_v14  ;;  %v1847_v26 = vmul.f32 0.5, %v912_v54 }
 0x2d4   :  { %v917_v61 = vpop.f32.mrf.mxu1 }
 0x2d5   :  { %v918_v20 = vadd.f32 %v917_v61, %v811_v12  ;;  %v1844_v19 = vmul.f32 0.5, %v914_v53 }
 0x2d6   :  { %v919_v50 = vpop.f32.mrf.mxu1 }
 0x2d7   :  { %v920_v18 = vadd.f32 %v919_v50, %v811_v12  ;;  %v1841_v46 = vmul.f32 0.5, %v918_v20 }
 0x2d8   :  { %v923_v59 = vpop.f32.mrf.mxu1 }
 0x2d9   :  { %v924_v11 = vadd.f32 %v923_v59, %v816_v6  ;;  %v1839_v25 = vmul.f32 0.5, %v920_v18 }
 0x2da   :  { %v925_v37 = vpop.f32.mrf.mxu1 }
 0x2db   :  { %v926_v1 = vadd.f32 %v925_v37, %v816_v6  ;;  %v1836_v24 = vmul.f32 0.5, %v924_v11 }
 0x2dc   :  { %v929_v44 = vpop.f32.mrf.mxu1 }
 0x2dd   :  { %v930_v4 = vadd.f32 %v929_v44, %v821_v10  ;;  %v1834_v33 = vmul.f32 0.5, %v926_v1 }
 0x2de   :  { %v931_v2 = vpop.f32.mrf.mxu1 }
 0x2df   :  { %v932_v9 = vadd.f32 %v931_v2, %v821_v10  ;;  %v1832_v16 = vmul.f32 0.5, %v930_v4 }
 0x2e0   :  { %v935_v60 = vpop.f32.mrf.mxu1 }
 0x2e1   :  { %v936_v47 = vadd.f32 %v935_v60, %v826_v49  ;;  %v1827_v5 = vmul.f32 0.5, %v932_v9 }
 0x2e2   :  { %v937_v34 = vpop.f32.mrf.mxu1 }
 0x2e3   :  { %v938_v3 = vadd.f32 %v937_v34, %v826_v49  ;;  %v1829_v56 = vmul.f32 0.5, %v936_v47  ;;  %1238 = vtanh.f32 %v1827_v5 }
 0x2e4   :  { %v941_v13 = vpop.f32.mrf.mxu1 }
 0x2e5   :  { %v942_v39 = vadd.f32 %v941_v13, %v831_v30  ;;  %v959_v57 = vmul.f32 0.5, %v938_v3 }
 0x2e6   :  { %v943_v62 = vpop.f32.mrf.mxu1 }
 0x2e7   :  { %v960_v17 = vmul.f32 0.5, %v942_v39  ;;  %v944_v27 = vadd.f32 %v943_v62, %v831_v30  ;;  %1240 = vtanh.f32 %v959_v57 }
 0x2e9   :  { %1242 = vtanh.f32 %v960_v17  ;;  %v961_v21 = vmul.f32 0.5, %v944_v27 }
 0x2ea   :  { %1244 = vtanh.f32 %v1829_v56 }
 0x2eb   :  { %1246 = vtanh.f32 %v961_v21 }
 0x2ec   :  { %1248 = vtanh.f32 %v1832_v16 }
 0x2ed   :  { %1250 = vtanh.f32 %v1834_v33 }
 0x2ee   :  { %1252 = vtanh.f32 %v1836_v24 }
 0x2ef   :  { %1254 = vtanh.f32 %v1839_v25 }
 0x2f0   :  { %1256 = vtanh.f32 %v1841_v46  ;;  %v1239_v8 = vpop.eup %1238 }
 0x2f1   :  { %1258 = vtanh.f32 %v1844_v19  ;;  %v989_v48 = vadd.f32 1.0, %v1239_v8 }
 0x2f2   :  { %1260 = vtanh.f32 %v1847_v26 }
 0x2f3   :  { %1262 = vtanh.f32 %v1850_v31  ;;  %v1005_v60 = vmul.f32 %v989_v48, %v1827_v5 }
 0x2f4   :  { %1264 = vtanh.f32 %v1853_v28  ;;  %v1241_v58 = vpop.eup %1240 }
 0x2f5   :  { %1266 = vtanh.f32 %v1856_v40  ;;  %v991_v15 = vadd.f32 1.0, %v1241_v58 }
 0x2f6   :  { %v1243_v36 = vpop.eup %1242  ;;  %1268 = vtanh.f32 %v1859_v7 }
 0x2f7   :  { %v1245_v55 = vpop.eup %1244  ;;  %v992_v45 = vadd.f32 1.0, %v1243_v36  ;;  %v1007_v37 = vmul.f32 %v991_v15, %v959_v57 }
 0x2f8   :  { %v1247_v23 = vpop.eup %1246  ;;  %v990_v63 = vadd.f32 1.0, %v1245_v55 }
 0x2f9   :  { %v1249_v41 = vpop.eup %1248  ;;  %v993_v32 = vadd.f32 1.0, %v1247_v23  ;;  %v1008_v30 = vmul.f32 %v992_v45, %v960_v17 }
 0x2fa   :  { %v1251_v51 = vpop.eup %1250  ;;  %v988_v50 = vadd.f32 1.0, %v1249_v41  ;;  %v1006_v2 = vmul.f32 %v990_v63, %v1829_v56 }
 0x2fb   :  { %v1253_v29 = vpop.eup %1252  ;;  %v1009_v0 = vmul.f32 %v993_v32, %v961_v21  ;;  %v987_v49 = vadd.f32 1.0, %v1251_v51 }
 0x2fc   :  { %v1255_v61 = vpop.eup %1254  ;;  %v986_v10 = vadd.f32 1.0, %v1253_v29  ;;  %v1004_v12 = vmul.f32 %v988_v50, %v1832_v16 }
 0x2fd   :  { %v1257_v59 = vpop.eup %1256  ;;  %1036 = vmatprep.subr.mxu1 %v1009_v0  ;;  %v985_v6 = vadd.f32 1.0, %v1255_v61  ;;  %v1003_v13 = vmul.f32 %v987_v49, %v1834_v33 }
 0x2fe   :  { %v1259_v44 = vpop.eup %1258  ;;  %1037 = vmatpush1.msra.mxu1 %v1008_v30  ;;  %v984_v34 = vadd.f32 1.0, %v1257_v59  ;;  %v1002_v14 = vmul.f32 %v986_v10, %v1836_v24  ;;  %v1015_v24 = vpop.permute.xlu0 %1014 }
 0x2ff   :  { %v1261_v9 = vpop.eup %1260  ;;  %1038 = vmatprep.subr.mxu1 %v1007_v37  ;;  %v983_v3 = vadd.f32 1.0, %v1259_v44  ;;  %v1001_v5 = vmul.f32 %v985_v6, %v1839_v25 }
 0x300   :  { %v1263_v47 = vpop.eup %1262  ;;  %1039 = vmatpush1.msra.mxu1 %v1006_v2  ;;  %v982_v39 = vadd.f32 1.0, %v1261_v9  ;;  %v1000_v62 = vmul.f32 %v984_v34, %v1841_v46 }
 0x301   :  { %v1265_v4 = vpop.eup %1264  ;;  %1040 = vmatprep.subr.mxu1 %v1005_v60  ;;  %v981_v56 = vadd.f32 1.0, %v1263_v47  ;;  %v999_v17 = vmul.f32 %v983_v3, %v1844_v19 }
 0x302   :  { %v1267_v1 = vpop.eup %1266  ;;  %1041 = vmatpush1.msra.mxu1 %v1004_v12  ;;  %v980_v57 = vadd.f32 1.0, %v1265_v4  ;;  %v998_v20 = vmul.f32 %v982_v39, %v1847_v26 }
 0x303   :  { %v1269_v11 = vpop.eup %1268  ;;  %1042 = vmatprep.subr.mxu1 %v1003_v13  ;;  %v979_v18 = vadd.f32 1.0, %v1267_v1  ;;  %v997_v16 = vmul.f32 %v981_v56, %v1850_v31 }
 0x304   :  { %1043 = vmatpush1.msra.mxu1 %v1002_v14  ;;  %v978_v27 = vadd.f32 1.0, %v1269_v11  ;;  %v996_v53 = vmul.f32 %v980_v57, %v1853_v28 }
 0x305   :  { %1044 = vmatprep.subr.mxu1 %v1001_v5  ;;  %v995_v33 = vmul.f32 %v979_v18, %v1856_v40 }
 0x306   :  { %1045 = vmatpush1.msra.mxu1 %v1000_v62  ;;  %v994_v21 = vmul.f32 %v978_v27, %v1859_v7 }
 0x307   :  { %1046 = vmatprep.subr.mxu1 %v999_v17 }
 0x308   :  { %1047 = vmatpush1.msra.mxu1 %v998_v20 }
 0x309   :  { %1048 = vmatprep.subr.mxu1 %v997_v16 }
 0x30a   :  { %1049 = vmatpush1.msra.mxu1 %v996_v53 }
 0x30b   :  { %1050 = vmatprep.subr.mxu1 %v995_v33 }
 0x30c   :  { %1051 = vmatpush1.msra.mxu1 %v994_v21 }
 0x30d   :  { %1126 = vmatmul.mubr.msk.f32.vlgmr.msra.gmra.mxu1 %vm439_vm0, %v1010_v43 }
 0x3cd   :  { %v1086_v54 = vpop.f32.mrf.mxu1 }
 0x3ce   :  { %v1087_v25 = vadd.f32 %v1086_v54, %v1015_v24 }
 0x3cf   :  { %v1088_v22 = vpop.f32.mrf.mxu1 }
 0x3d0   :  { %v1089_v52 = vadd.f32 %v1088_v22, %v1015_v24 }
 0x3d2   :  { %v1093_v38 = vcombine.low %v1087_v25, %v1089_v52 }
 0x3d4   :  { %1095 = vst [vmem:[#allocation2] sm:$0x77] %v1093_v38 }
 0x3d5   :  { %1281 = shalt.err (!%p1278_p4)
}
 0x3d6   :  { %1105 = dma.vmem_to_hbm [thread:$0]  %s1103_s20, 128, %s1895_s9, [#allocation3]  }
 0x3d7   :  { %1290 = dma.done.wait [#allocation3], 128  }
 0x3d8   :  { %1291 = vsyncadd [#allocation3], 4294967168 }
 0x3d9   :  { %1109 = vsyncpa [#allocation3], 1 }

</bundles_post_ra>
